<compile_context>
chip_gen: v7x
topology: tpu7x:2x2x1
jax: 0.10.0
libtpu: 0.0.40
codegen_flags: <defaults>
</compile_context>

<pallas_src>
import jax
import jax.numpy as jnp
import numpy as np
from jax.experimental import pallas as pl
from jax.experimental.pallas import tpu as pltpu


# ----------------------------------------------------------------------------
# Pallas kernel: fused linear (matmul + bias) for the Laplacian PE embedding
# ----------------------------------------------------------------------------
def _lape_linear_kernel(lap_ref, w_ref, b_ref, o_ref):
    # lap_ref: (bm, K)  w_ref: (K, E)  b_ref: (1, E)  o_ref: (bm, E)
    acc = jnp.dot(lap_ref[...], w_ref[...], preferred_element_type=jnp.float32)
    o_ref[...] = (acc + b_ref[...]).astype(o_ref.dtype)


def laplacian_pe(lap_mx, w, b, *, block_m=512):
    """LaplacianPE forward.

    lap_mx : (N, lape_dim)   Laplacian eigenvector positional features
    w      : (lape_dim, embed_dim)   == torch weight transposed
    b      : (embed_dim,)
    returns: (1, 1, N, embed_dim)
    """
    N, K = lap_mx.shape
    E = w.shape[1]
    b2 = b.reshape(1, E)
    out_shape = jax.ShapeDtypeStruct((N, E), lap_mx.dtype)

    if N <= block_m:
        # Small case: whole problem in one grid-less call (everything fits
        # VMEM trivially; avoids per-step pipeline overhead).
        out2d = pl.pallas_call(_lape_linear_kernel, out_shape=out_shape)(
            lap_mx, w, b2
        )
    else:
        # Large node counts: tile rows; weights/bias stay VMEM-resident
        # (constant block index), row axis is 'parallel' for v7x megacore.
        bm = block_m
        grid = (pl.cdiv(N, bm),)
        out2d = pl.pallas_call(
            _lape_linear_kernel,
            out_shape=out_shape,
            grid=grid,
            in_specs=[
                pl.BlockSpec((bm, K), lambda i: (i, 0)),
                pl.BlockSpec((K, E), lambda i: (0, 0)),
                pl.BlockSpec((1, E), lambda i: (0, 0)),
            ],
            out_specs=pl.BlockSpec((bm, E), lambda i: (i, 0)),
            compiler_params=pltpu.CompilerParams(
                dimension_semantics=("parallel",)
            ),
        )(lap_mx, w, b2)

    # unsqueeze(0).unsqueeze(0)
    return out2d.reshape(1, 1, N, E)


# ----------------------------------------------------------------------------
# Pure-JAX reference (for correctness check)
# ----------------------------------------------------------------------------
def reference_forward(lap_mx, w, b):
    return (lap_mx @ w + b)[None, None, :, :]


# ----------------------------------------------------------------------------
# Main
# ----------------------------------------------------------------------------
if __name__ == "__main__":
    # Small shapes consistent with the module: N nodes, lape_dim -> embed_dim.
    N = 16          # number of graph nodes (spatial)
    lape_dim = 8    # Laplacian eigenvector feature dim
    embed_dim = 32  # model hidden dim

    key = jax.random.PRNGKey(0)
    k_lap, k_w, k_b = jax.random.split(key, 3)

    lap_mx = jax.random.normal(k_lap, (N, lape_dim), jnp.float32)
    # weight stored as (in_features, out_features) == torch W^T
    w = jax.random.normal(k_w, (lape_dim, embed_dim), jnp.float32) * 0.1
    b = jax.random.normal(k_b, (embed_dim,), jnp.float32) * 0.1

    out = laplacian_pe(lap_mx, w, b)
    out = jax.block_until_ready(out)
    assert out.shape == (1, 1, N, embed_dim)

    ref = reference_forward(lap_mx, w, b)
    np.testing.assert_allclose(np.asarray(out), np.asarray(ref),
                               atol=1e-5, rtol=1e-5)
    print("KERNEL_OK")
</pallas_src>

<mosaic_0001>
module attributes {stable_mosaic.version = 11 : i64} {
  func.func @_lape_linear_kernel(%arg0: memref<16x8xf32, #tpu.memory_space<vmem>>, %arg1: memref<8x32xf32, #tpu.memory_space<vmem>>, %arg2: memref<1x32xf32, #tpu.memory_space<vmem>>, %arg3: memref<16x32xf32, #tpu.memory_space<vmem>>) attributes {dimension_semantics = [], scalar_prefetch = 0 : i64, scratch_operands = 0 : i64, tpu.core_type = #tpu.core_type<tc>} {
    %c0 = arith.constant 0 : index
    %c0_0 = arith.constant 0 : index
    %0 = vector.load %arg0[%c0, %c0_0] : memref<16x8xf32, #tpu.memory_space<vmem>>, vector<16x8xf32>
    %c0_1 = arith.constant 0 : index
    %c0_2 = arith.constant 0 : index
    %1 = vector.load %arg1[%c0_1, %c0_2] : memref<8x32xf32, #tpu.memory_space<vmem>>, vector<8x32xf32>
    %cst = arith.constant dense<0.000000e+00> : vector<16x32xf32>
    %2 = tpu.matmul %0, %1, %cst {dimension_numbers = #tpu.dot_dimension_numbers<[1], [0], [0], [1], [0, 0, 1, 1], [], []>} : vector<16x8xf32>, vector<8x32xf32>, vector<16x32xf32> -> vector<16x32xf32>
    %c0_3 = arith.constant 0 : index
    %c0_4 = arith.constant 0 : index
    %3 = vector.load %arg2[%c0_3, %c0_4] : memref<1x32xf32, #tpu.memory_space<vmem>>, vector<1x32xf32>
    %4 = vector.broadcast %3 : vector<1x32xf32> to vector<16x32xf32>
    %5 = arith.addf %2, %4 : vector<16x32xf32>
    %c0_5 = arith.constant 0 : index
    %c0_6 = arith.constant 0 : index
    %6 = vector.load %arg3[%c0_5, %c0_6] : memref<16x32xf32, #tpu.memory_space<vmem>>, vector<16x32xf32>
    tpu.vector_store %arg3[%c0_5, %c0_6], %5 {strides = array<i32>} : memref<16x32xf32, #tpu.memory_space<vmem>>, vector<16x32xf32>,
    return
  }
}

</mosaic_0001>

<bundles_post_ra>
// kernel: tpu_custom_call.1
= control target key start
LH: loop header
LB: loop body
LE: loop exit
PB: predicated region body
PF: predicated region fallthrough
CT: control target
= control target key end

     0   :  { %vm25_vm0 = vcmask 64512   ;;  %s211_s0 = inlined_call_operand.vmem [shape: f32[16,8], index: 0, kind: input, shape index: {}]   ;;  %s212_s1 = inlined_call_operand.vmem [shape: f32[8,32], index: 1, kind: input, shape index: {}]   ;;  %s213_s2 = inlined_call_operand.vmem [shape: f32[1,32], index: 2, kind: input, shape index: {}]   ;;  %s214_s3 = inlined_call_operand.hbm [shape: f32[16,32], index: 3, kind: output, shape index: {}]  }
   0x1   :  { %v17_v0 = vld [vmem:[%s212_s1] sm:$0xff]  ;;  %v16_v2 = vld [vmem:[%s211_s0 + $0x8] sm:$0xff] }
   0x2   :  { %v15_v1 = vld [vmem:[%s211_s0] sm:$0xff]  ;;  %132 = vmatprep.subr.mxu0 %v17_v0 }
   0x3   :  { %134 = vmatprep.mubr.msk.f32.mxu0 %vm25_vm0, %v15_v1 }
   0x4   :  { %8 = vsyncpa [#allocation3], 0  ;;  %133 = vmatpush3.msra.mxu0 %v17_v0  ;;  %v126_v3 = vld [vmem:[%s213_s2] ss:$0 sm:$0xff]  ;;  %s164_s20 = smov [#allocation2]   ;;  %vm107_vm1 = vcmask 261120  }
   0x5   :  { %135 = vmatmul.mubr.msk.f32.vlgmr.msra.gmra.mrb[0].mxu0 %vm25_vm0, %v16_v2  ;;  %s115_s1 = sshll.u32 %s164_s20, 4  ;;  %s116_s1 = int_to_ptr.vmem [resolvable:$true] %s115_s1 }
   0x6   :  { %s140_s0 = scalar_lea.vmem %s116_s1, 256  ;;  %p145_p1 = scmp.lt.s32.totalorder %s116_s1, %s116_s1 }
   0x7   :  { %p141_p0 = scmp.ne.s32.totalorder %s116_s1, %s140_s0  ;;  %p146_p2 = scmp.lt.s32.totalorder %s140_s0, %s140_s0 }
   0x9   :  { %p147_p3 = por %p146_p2, %p145_p1 }
   0xb   :  { %p148_p4 = pnand %p147_p3, %p141_p0 }
  0xd8   :  { %v136_v4 = vpop.f32.mrb[0].mxu0 }
  0xd9   :  { %v104_v5 = vadd.f32 %v136_v4, %v126_v3  ;;  %v98_v6 = vpop.f32.mrb[1].mxu0 }
  0xda   :  { %v99_v7 = vadd.f32 %v126_v3, %v98_v6 }
  0xdb   :  { %109 = vst.msk [vmem:[#allocation2 + $0x8] sm:$0xff] %vm107_vm1, %v104_v5 }
  0xdc   :  { %108 = vst.msk [vmem:[#allocation2] sm:$0xff] %vm107_vm1, %v99_v7 }
  0xdd   :  { %151 = shalt.err (!%p148_p4)
}
  0xde   :  { %s152_s2 = scalar_lea.hbm %s214_s3, 256 }
  0xdf   :  { %p153_p5 = scmp.ne.s32.totalorder %s214_s3, %s152_s2  ;;  %p156_p6 = scmp.lt.u32.totalorder %s152_s2, %s214_s3 }
  0xe1   :  { %p158_p7 = pnand %p156_p6, %p153_p5 }
  0xe3   :  { %161 = shalt.err (!%p158_p7)
}
  0xe4   :  { %s165_s27 = smov 128   ;;  %s166_s28 = smov 8  }
  0xe5   :  { %121 = dma.vmem_to_hbm [thread:$0]  %s116_s1, 256, %s214_s3, [#allocation3], %s165_s27, %s165_s27, %s166_s28  }
  0xe6   :  { %162 = dma.done.wait [#allocation3], 256  }
  0xe7   :  { %163 = vsyncadd [#allocation3], 4294967040 }
  0xe8   :  { %125 = vsyncpa [#allocation3], 1 }

</bundles_post_ra>
